<compile_context>
chip_gen: v7x
topology: tpu7x:2x2x1
jax: 0.10.0
libtpu: 0.0.40
codegen_flags: <defaults>
</compile_context>

<pallas_src>
import math
import jax
import jax.numpy as jnp
from jax.experimental import pallas as pl
from jax.experimental.pallas import tpu as pltpu


# ----------------------------- Pallas kernel --------------------------------

def mlp_kernel(x_ref,
               w_stem_ref, b_stem_ref,
               w_h0_ref, b_h0_ref,
               w_h1_ref, b_h1_ref,
               w_reg_ref, b_reg_ref,
               o_ref):
    # stem: in-kernel bf16 cast of x, bf16 x bf16 MXU matmul, f32 accumulation;
    # bias-add + ReLU stay in f32 (v5e has no bf16 VPU path).
    h = jnp.dot(x_ref[...].astype(jnp.bfloat16), w_stem_ref[...],
                preferred_element_type=jnp.float32)
    h = jnp.maximum(h + b_stem_ref[...], 0.0)

    # hidden layer 0
    h = jnp.dot(h.astype(jnp.bfloat16), w_h0_ref[...],
                preferred_element_type=jnp.float32)
    h = jnp.maximum(h + b_h0_ref[...], 0.0)

    # hidden layer 1
    h = jnp.dot(h.astype(jnp.bfloat16), w_h1_ref[...],
                preferred_element_type=jnp.float32)
    h = jnp.maximum(h + b_h1_ref[...], 0.0)

    # dropout (eval mode) -> identity

    # regressor (n_hidden -> 1) on the VPU/XLU: broadcast-mul + lane reduction.
    # Avoids a nearly-empty 128->1 MXU matmul at the end of the serial chain.
    y = jnp.sum(h * w_reg_ref[...], axis=-1, keepdims=True) + b_reg_ref[...]
    o_ref[...] = y.astype(o_ref.dtype)


# ------------------------------ Wrapper --------------------------------------

def _round_up(v, m):
    return (v + m - 1) // m * m


def net_forward(x, params, *, tb=512):
    """x: (B, n_feature) float32.

    params:
      w_stem (F,H) bf16, b_stem (1,H) f32,
      w_h0/w_h1 (H,H) bf16, b_h0/b_h1 (1,H) f32,
      w_reg (1,H) f32 (row layout for the VPU reduction), b_reg (1,1) f32.
    Returns (B, 1) float32.
    """
    B, F = x.shape
    H = params["w_stem"].shape[1]
    n_output = params["b_reg"].shape[1]
    assert n_output == 1, "kernel regressor path supports n_output == 1 only"

    # Batch tile:
    #  * multiple of 8 sublanes (f32 x tile / f32 output tile),
    #  * capped at round_up(ceil(B/2), 128) so the grid has >= 2 steps once
    #    B > 128 (keeps both v7x TensorCores busy; neutral on v5e/v6e),
    #  * capped at round_up(B, 8) so tiny batches use a single small tile.
    tb = max(8, _round_up(int(tb), 8))
    TB = min(tb,
             _round_up((B + 1) // 2, 128),
             _round_up(B, 8))
    TB = max(TB, 8)
    grid = pl.cdiv(B, TB)

    w_stem, b_stem = params["w_stem"], params["b_stem"]
    w_h0, b_h0 = params["w_h0"], params["b_h0"]
    w_h1, b_h1 = params["w_h1"], params["b_h1"]
    w_reg, b_reg = params["w_reg"], params["b_reg"]

    def resident(a):
        # Whole-array block whose block index never changes -> stays VMEM
        # resident across all batch tiles (no re-DMA per grid step).
        return pl.BlockSpec(a.shape, lambda i: (0, 0))

    in_specs = [
        pl.BlockSpec((TB, F), lambda i: (i, 0)),   # x: tiled along batch (f32)
        resident(w_stem), resident(b_stem),
        resident(w_h0), resident(b_h0),
        resident(w_h1), resident(b_h1),
        resident(w_reg), resident(b_reg),
    ]
    out_specs = pl.BlockSpec((TB, n_output), lambda i: (i, 0))

    flops = 2 * B * (F * H + 2 * H * H + H * n_output)
    bytes_accessed = int(
        x.size * x.dtype.itemsize
        + sum(int(p.size) * p.dtype.itemsize for p in params.values())
        + B * n_output * 4
    )

    out = pl.pallas_call(
        mlp_kernel,
        out_shape=jax.ShapeDtypeStruct((B, n_output), jnp.float32),
        grid_spec=pltpu.PrefetchScalarGridSpec(
            num_scalar_prefetch=0,
            grid=(grid,),
            in_specs=in_specs,
            out_specs=out_specs,
        ),
        compiler_params=pltpu.CompilerParams(
            dimension_semantics=("parallel",)),
        cost_estimate=pl.CostEstimate(
            flops=flops, transcendentals=0, bytes_accessed=bytes_accessed),
    )(x, w_stem, b_stem, w_h0, b_h0, w_h1, b_h1, w_reg, b_reg)

    return out


# --------------------------- Parameter init ----------------------------------

def kaiming_uniform(key, fan_in, fan_out):
    # Matches Net.init_weights: kaiming_uniform_(mode='fan_in',
    # nonlinearity='relu') -> bound = sqrt(6 / fan_in); biases zeroed.
    # (nn.Linear's *default* init differs; use a trained checkpoint if exact
    # PyTorch-default distributions are required.)
    bound = math.sqrt(6.0 / fan_in)
    # stored as (in, out) so the kernel can do x @ W
    return jax.random.uniform(key, (fan_in, fan_out),
                              minval=-bound, maxval=bound, dtype=jnp.float32)


def init_params(key, n_feature, n_hidden, n_output=1):
    assert n_output == 1, "regressor is implemented for n_output == 1"
    ks = jax.random.split(key, 4)
    return {
        # matmul weights in bf16 (f32 accumulation in-kernel)
        "w_stem": kaiming_uniform(ks[0], n_feature, n_hidden).astype(jnp.bfloat16),
        "b_stem": jnp.zeros((1, n_hidden), jnp.float32),
        "w_h0":   kaiming_uniform(ks[1], n_hidden, n_hidden).astype(jnp.bfloat16),
        "b_h0":   jnp.zeros((1, n_hidden), jnp.float32),
        "w_h1":   kaiming_uniform(ks[2], n_hidden, n_hidden).astype(jnp.bfloat16),
        "b_h1":   jnp.zeros((1, n_hidden), jnp.float32),
        # regressor kept f32 as a (1, H) row -> VPU mul + lane reduction
        "w_reg":  kaiming_uniform(ks[3], n_hidden, n_output).reshape(1, n_hidden),
        "b_reg":  jnp.zeros((1, n_output), jnp.float32),
    }


def net_reference(x, p):
    # Pure-JAX reference with identical bf16 rounding of matmul inputs.
    xb = x.astype(jnp.bfloat16).astype(jnp.float32)
    h = jnp.maximum(xb @ p["w_stem"].astype(jnp.float32) + p["b_stem"], 0.0)
    h = jnp.maximum(h.astype(jnp.bfloat16).astype(jnp.float32)
                    @ p["w_h0"].astype(jnp.float32) + p["b_h0"], 0.0)
    h = jnp.maximum(h.astype(jnp.bfloat16).astype(jnp.float32)
                    @ p["w_h1"].astype(jnp.float32) + p["b_h1"], 0.0)
    return jnp.sum(h * p["w_reg"], axis=-1, keepdims=True) + p["b_reg"]


# -------------------------------- Main ----------------------------------------

if __name__ == "__main__":
    # Small shapes consistent with the module's forward: (batch, n_feature) MLP.
    n_feature = 32
    n_hidden = 128
    n_output = 1

    key = jax.random.PRNGKey(0)
    k_x, k_p, k_x2 = jax.random.split(key, 3)
    params = init_params(k_p, n_feature, n_hidden, n_output)

    # Tiny case: single grid step (B=8, TB clamps to 8).
    x = jax.random.normal(k_x, (8, n_feature), dtype=jnp.float32)
    out = jax.block_until_ready(net_forward(x, params))
    ref = net_reference(x, params)
    assert out.shape == (8, n_output)
    assert jnp.allclose(out, ref, atol=2e-3, rtol=2e-3), "mismatch vs JAX reference (B=8)"

    # Batched case exercising the tiled grid with a partial last block:
    # B=260 -> TB=256, grid=2 (second step has only 4 valid rows; masked store).
    x2 = jax.random.normal(k_x2, (260, n_feature), dtype=jnp.float32)
    out2 = jax.block_until_ready(net_forward(x2, params))
    ref2 = net_reference(x2, params)
    assert out2.shape == (260, n_output)
    assert jnp.allclose(out2, ref2, atol=2e-3, rtol=2e-3), "mismatch vs JAX reference (B=260)"

    print("KERNEL_OK")
</pallas_src>

<mosaic_0001>
module attributes {stable_mosaic.version = 11 : i64} {
  func.func @mlp_kernel(%arg0: i32, %arg1: memref<8x32xf32, #tpu.memory_space<vmem>>, %arg2: memref<32x128xbf16, #tpu.memory_space<vmem>>, %arg3: memref<1x128xf32, #tpu.memory_space<vmem>>, %arg4: memref<128x128xbf16, #tpu.memory_space<vmem>>, %arg5: memref<1x128xf32, #tpu.memory_space<vmem>>, %arg6: memref<128x128xbf16, #tpu.memory_space<vmem>>, %arg7: memref<1x128xf32, #tpu.memory_space<vmem>>, %arg8: memref<1x128xf32, #tpu.memory_space<vmem>>, %arg9: memref<1x1xf32, #tpu.memory_space<vmem>>, %arg10: memref<8x1xf32, #tpu.memory_space<vmem>>) attributes {dimension_semantics = [#tpu.dimension_semantics<parallel>], iteration_bounds = array<i64: 1>, scalar_prefetch = 0 : i64, scratch_operands = 0 : i64, tpu.core_type = #tpu.core_type<tc>, window_params = [{transform_indices = @transform_0, window_bounds = array<i64: 8, 32>}, {pipeline_mode = #tpu.pipeline_mode<synchronous>, transform_indices = @transform_1, window_bounds = array<i64: 32, 128>}, {pipeline_mode = #tpu.pipeline_mode<synchronous>, transform_indices = @transform_2, window_bounds = array<i64: 1, 128>}, {pipeline_mode = #tpu.pipeline_mode<synchronous>, transform_indices = @transform_3, window_bounds = array<i64: 128, 128>}, {pipeline_mode = #tpu.pipeline_mode<synchronous>, transform_indices = @transform_4, window_bounds = array<i64: 1, 128>}, {pipeline_mode = #tpu.pipeline_mode<synchronous>, transform_indices = @transform_5, window_bounds = array<i64: 128, 128>}, {pipeline_mode = #tpu.pipeline_mode<synchronous>, transform_indices = @transform_6, window_bounds = array<i64: 1, 128>}, {pipeline_mode = #tpu.pipeline_mode<synchronous>, transform_indices = @transform_7, window_bounds = array<i64: 1, 128>}, {pipeline_mode = #tpu.pipeline_mode<synchronous>, transform_indices = @transform_8, window_bounds = array<i64: 1, 1>}, {transform_indices = @transform_9, window_bounds = array<i64: 8, 1>}]} {
    %c0 = arith.constant 0 : index
    %c0_0 = arith.constant 0 : index
    %0 = vector.load %arg1[%c0, %c0_0] : memref<8x32xf32, #tpu.memory_space<vmem>>, vector<8x32xf32>
    %1 = arith.truncf %0 : vector<8x32xf32> to vector<8x32xbf16>
    %c0_1 = arith.constant 0 : index
    %c0_2 = arith.constant 0 : index
    %2 = vector.load %arg2[%c0_1, %c0_2] : memref<32x128xbf16, #tpu.memory_space<vmem>>, vector<32x128xbf16>
    %cst = arith.constant dense<0.000000e+00> : vector<8x128xf32>
    %3 = tpu.matmul %1, %2, %cst {dimension_numbers = #tpu.dot_dimension_numbers<[1], [0], [0], [1], [0, 0, 1, 1], [], []>} : vector<8x32xbf16>, vector<32x128xbf16>, vector<8x128xf32> -> vector<8x128xf32>
    %c0_3 = arith.constant 0 : index
    %c0_4 = arith.constant 0 : index
    %4 = vector.load %arg3[%c0_3, %c0_4] : memref<1x128xf32, #tpu.memory_space<vmem>>, vector<1x128xf32>
    %5 = vector.broadcast %4 : vector<1x128xf32> to vector<8x128xf32>
    %6 = arith.addf %3, %5 : vector<8x128xf32>
    %cst_5 = arith.constant 0.000000e+00 : f32
    %7 = vector.broadcast %cst_5 : f32 to vector<8x128xf32>
    %8 = arith.maximumf %6, %7 : vector<8x128xf32>
    %9 = arith.truncf %8 : vector<8x128xf32> to vector<8x128xbf16>
    %c0_6 = arith.constant 0 : index
    %c0_7 = arith.constant 0 : index
    %10 = vector.load %arg4[%c0_6, %c0_7] : memref<128x128xbf16, #tpu.memory_space<vmem>>, vector<128x128xbf16>
    %cst_8 = arith.constant dense<0.000000e+00> : vector<8x128xf32>
    %11 = tpu.matmul %9, %10, %cst_8 {dimension_numbers = #tpu.dot_dimension_numbers<[1], [0], [0], [1], [0, 0, 1, 1], [], []>} : vector<8x128xbf16>, vector<128x128xbf16>, vector<8x128xf32> -> vector<8x128xf32>
    %c0_9 = arith.constant 0 : index
    %c0_10 = arith.constant 0 : index
    %12 = vector.load %arg5[%c0_9, %c0_10] : memref<1x128xf32, #tpu.memory_space<vmem>>, vector<1x128xf32>
    %13 = vector.broadcast %12 : vector<1x128xf32> to vector<8x128xf32>
    %14 = arith.addf %11, %13 : vector<8x128xf32>
    %cst_11 = arith.constant 0.000000e+00 : f32
    %15 = vector.broadcast %cst_11 : f32 to vector<8x128xf32>
    %16 = arith.maximumf %14, %15 : vector<8x128xf32>
    %17 = arith.truncf %16 : vector<8x128xf32> to vector<8x128xbf16>
    %c0_12 = arith.constant 0 : index
    %c0_13 = arith.constant 0 : index
    %18 = vector.load %arg6[%c0_12, %c0_13] : memref<128x128xbf16, #tpu.memory_space<vmem>>, vector<128x128xbf16>
    %cst_14 = arith.constant dense<0.000000e+00> : vector<8x128xf32>
    %19 = tpu.matmul %17, %18, %cst_14 {dimension_numbers = #tpu.dot_dimension_numbers<[1], [0], [0], [1], [0, 0, 1, 1], [], []>} : vector<8x128xbf16>, vector<128x128xbf16>, vector<8x128xf32> -> vector<8x128xf32>
    %c0_15 = arith.constant 0 : index
    %c0_16 = arith.constant 0 : index
    %20 = vector.load %arg7[%c0_15, %c0_16] : memref<1x128xf32, #tpu.memory_space<vmem>>, vector<1x128xf32>
    %21 = vector.broadcast %20 : vector<1x128xf32> to vector<8x128xf32>
    %22 = arith.addf %19, %21 : vector<8x128xf32>
    %cst_17 = arith.constant 0.000000e+00 : f32
    %23 = vector.broadcast %cst_17 : f32 to vector<8x128xf32>
    %24 = arith.maximumf %22, %23 : vector<8x128xf32>
    %c0_18 = arith.constant 0 : index
    %c0_19 = arith.constant 0 : index
    %25 = vector.load %arg8[%c0_18, %c0_19] : memref<1x128xf32, #tpu.memory_space<vmem>>, vector<1x128xf32>
    %26 = vector.broadcast %25 : vector<1x128xf32> to vector<8x128xf32>
    %27 = arith.mulf %24, %26 : vector<8x128xf32>
    %cst_20 = arith.constant dense<0.000000e+00> : vector<8xf32>
    %28 = vector.multi_reduction <add>, %27, %cst_20 [1] : vector<8x128xf32> to vector<8xf32>
    %29 = vector.shape_cast %28 : vector<8xf32> to vector<8x1xf32>
    %c0_21 = arith.constant 0 : index
    %c0_22 = arith.constant 0 : index
    %30 = vector.load %arg9[%c0_21, %c0_22] : memref<1x1xf32, #tpu.memory_space<vmem>>, vector<1x1xf32>
    %31 = vector.broadcast %30 : vector<1x1xf32> to vector<8x1xf32>
    %32 = arith.addf %29, %31 : vector<8x1xf32>
    %c0_23 = arith.constant 0 : index
    %c0_24 = arith.constant 0 : index
    %33 = vector.load %arg10[%c0_23, %c0_24] : memref<8x1xf32, #tpu.memory_space<vmem>>, vector<8x1xf32>
    tpu.vector_store %arg10[%c0_23, %c0_24], %32 {strides = array<i32>} : memref<8x1xf32, #tpu.memory_space<vmem>>, vector<8x1xf32>,
    return
  }
  func.func @transform_0(%arg0: i32) -> (i32, i32) {
    %c0_i32 = arith.constant 0 : i32
    %c0_i32_0 = arith.constant 0 : i32
    return %arg0, %c0_i32 : i32, i32
  }
  func.func @transform_1(%arg0: i32) -> (i32, i32) {
    %c0_i32 = arith.constant 0 : i32
    %c0_i32_0 = arith.constant 0 : i32
    %c0_i32_1 = arith.constant 0 : i32
    return %c0_i32, %c0_i32_0 : i32, i32
  }
  func.func @transform_2(%arg0: i32) -> (i32, i32) {
    %c0_i32 = arith.constant 0 : i32
    %c0_i32_0 = arith.constant 0 : i32
    %c0_i32_1 = arith.constant 0 : i32
    return %c0_i32, %c0_i32_0 : i32, i32
  }
  func.func @transform_3(%arg0: i32) -> (i32, i32) {
    %c0_i32 = arith.constant 0 : i32
    %c0_i32_0 = arith.constant 0 : i32
    %c0_i32_1 = arith.constant 0 : i32
    return %c0_i32, %c0_i32_0 : i32, i32
  }
  func.func @transform_4(%arg0: i32) -> (i32, i32) {
    %c0_i32 = arith.constant 0 : i32
    %c0_i32_0 = arith.constant 0 : i32
    %c0_i32_1 = arith.constant 0 : i32
    return %c0_i32, %c0_i32_0 : i32, i32
  }
  func.func @transform_5(%arg0: i32) -> (i32, i32) {
    %c0_i32 = arith.constant 0 : i32
    %c0_i32_0 = arith.constant 0 : i32
    %c0_i32_1 = arith.constant 0 : i32
    return %c0_i32, %c0_i32_0 : i32, i32
  }
  func.func @transform_6(%arg0: i32) -> (i32, i32) {
    %c0_i32 = arith.constant 0 : i32
    %c0_i32_0 = arith.constant 0 : i32
    %c0_i32_1 = arith.constant 0 : i32
    return %c0_i32, %c0_i32_0 : i32, i32
  }
  func.func @transform_7(%arg0: i32) -> (i32, i32) {
    %c0_i32 = arith.constant 0 : i32
    %c0_i32_0 = arith.constant 0 : i32
    %c0_i32_1 = arith.constant 0 : i32
    return %c0_i32, %c0_i32_0 : i32, i32
  }
  func.func @transform_8(%arg0: i32) -> (i32, i32) {
    %c0_i32 = arith.constant 0 : i32
    %c0_i32_0 = arith.constant 0 : i32
    %c0_i32_1 = arith.constant 0 : i32
    return %c0_i32, %c0_i32_0 : i32, i32
  }
  func.func @transform_9(%arg0: i32) -> (i32, i32) {
    %c0_i32 = arith.constant 0 : i32
    %c0_i32_0 = arith.constant 0 : i32
    return %arg0, %c0_i32 : i32, i32
  }
}

</mosaic_0001>

<bundles_post_ra>
// kernel: tpu_custom_call.1
= control target key start
LH: loop header
LB: loop body
LE: loop exit
PB: predicated region body
PF: predicated region fallthrough
CT: control target
= control target key end

     0   :  { %s781_s0 = inlined_call_operand.hbm [shape: f32[8,32], index: 0, kind: input, shape index: {}]   ;;  %s782_s1 = inlined_call_operand.hbm [shape: bf16[32,128], index: 1, kind: input, shape index: {}]   ;;  %s783_s2 = inlined_call_operand.vmem [shape: f32[1,128], index: 2, kind: input, shape index: {}]   ;;  %s784_s3 = inlined_call_operand.hbm [shape: bf16[128,128], index: 3, kind: input, shape index: {}]   ;;  %s785_s4 = inlined_call_operand.vmem [shape: f32[1,128], index: 4, kind: input, shape index: {}]   ;;  %s786_s5 = inlined_call_operand.hbm [shape: bf16[128,128], index: 5, kind: input, shape index: {}]   ;;  %s787_s6 = inlined_call_operand.vmem [shape: f32[1,128], index: 6, kind: input, shape index: {}]   ;;  %s788_s7 = inlined_call_operand.vmem [shape: f32[1,128], index: 7, kind: input, shape index: {}]   ;;  %s789_s8 = inlined_call_operand.<no memory space> [shape: f32[1,1], index: 8, kind: input, shape index: {}]   ;;  %s790_s9 = inlined_call_operand.vmem [shape: f32[8,1], index: 9, kind: output, shape index: {}]  }
   0x1   :  { %v14_v0 = vstv %s789_s8 }
   0x2   :  { %15 = vst [vmem:[#allocation2] sm:$0x1] %v14_v0 }
   0x3   :  { %16 = vsyncpa [#allocation4], 0 }
   0x4   :  { %17 = vsyncpa [#allocation6], 0 }
   0x5   :  { %18 = vsyncpa [#allocation9], 0  ;;  %s624_s11 = smov [#allocation5]   ;;  %s530_s15 = scalar_lea.hbm %s782_s1, 256 }
   0x6   :  { %s34_s12 = sshll.u32 %s624_s11, 4  ;;  %p531_p0 = scmp.ne.s32.totalorder %s782_s1, %s530_s15  ;;  %s35_s12 = int_to_ptr.vmem [resolvable:$true] %s34_s12 }
   0x7   :  { %p534_p1 = scmp.lt.u32.totalorder %s530_s15, %s782_s1 }
   0x9   :  { %p536_p2 = pnand %p534_p1, %p531_p0 }
   0xb   :  { %539 = shalt.err (!%p536_p2)
}
   0xc   :  { %s540_s8 = scalar_lea.vmem %s35_s12, 256  ;;  %p545_p4 = scmp.lt.s32.totalorder %s35_s12, %s35_s12 }
   0xd   :  { %p541_p3 = scmp.ne.s32.totalorder %s35_s12, %s540_s8  ;;  %p546_p5 = scmp.lt.s32.totalorder %s540_s8, %s540_s8 }
   0xf   :  { %p547_p6 = por %p546_p5, %p545_p4 }
  0x11   :  { %p548_p7 = pnand %p547_p6, %p541_p3 }
  0x13   :  { %551 = shalt.err (!%p548_p7)
}
  0x14   :  { %s625_s20 = smov 64   ;;  %s626_s21 = smov 4  }
  0x15   :  { %40 = dma.hbm_to_vmem [thread:$0]  %s782_s1, 256, %s35_s12, [#allocation6], %s625_s20, %s625_s20, %s626_s21  }
  0x16   :  { %s627_s24 = smov [#allocation3]   ;;  %s628_s26 = smov [#allocation7]  }
  0x17   :  { %s25_s25 = sshll.u32 %s627_s24, 4  ;;  %s48_s27 = sshll.u32 %s628_s26, 4  ;;  %s26_s25 = int_to_ptr.vmem [resolvable:$true] %s25_s25  ;;  %s49_s27 = int_to_ptr.vmem [resolvable:$true] %s48_s27 }
  0x18   :  { %s552_s30 = scalar_lea.hbm %s781_s0, 128 }
  0x19   :  { %p553_p8 = scmp.ne.s32.totalorder %s781_s0, %s552_s30  ;;  %p556_p9 = scmp.lt.u32.totalorder %s552_s30, %s781_s0 }
  0x1b   :  { %p558_p10 = pnand %p556_p9, %p553_p8 }
  0x1d   :  { %561 = shalt.err (!%p558_p10)
}
  0x1e   :  { %s562_s1 = scalar_lea.vmem %s26_s25, 128  ;;  %p567_p12 = scmp.lt.s32.totalorder %s26_s25, %s26_s25 }
  0x1f   :  { %p563_p11 = scmp.ne.s32.totalorder %s26_s25, %s562_s1  ;;  %p568_p13 = scmp.lt.s32.totalorder %s562_s1, %s562_s1 }
  0x21   :  { %p569_p0 = por %p568_p13, %p567_p12 }
  0x23   :  { %p570_p1 = pnand %p569_p0, %p563_p11 }
  0x25   :  { %573 = shalt.err (!%p570_p1)
}
  0x26   :  { %28 = dma.hbm_to_vmem [thread:$0]  %s781_s0, 128, %s26_s25, [#allocation4]  }
  0x27   :  { %s574_s18 = scalar_lea.hbm %s784_s3, 1024 }
  0x28   :  { %p575_p2 = scmp.ne.s32.totalorder %s784_s3, %s574_s18  ;;  %p578_p3 = scmp.lt.u32.totalorder %s574_s18, %s784_s3 }
  0x2a   :  { %p580_p4 = pnand %p578_p3, %p575_p2 }
  0x2c   :  { %583 = shalt.err (!%p580_p4)
}
  0x2d   :  { %s584_s24 = scalar_lea.vmem %s49_s27, 1024  ;;  %p589_p6 = scmp.lt.s32.totalorder %s49_s27, %s49_s27 }
  0x2e   :  { %p585_p5 = scmp.ne.s32.totalorder %s49_s27, %s584_s24  ;;  %p590_p7 = scmp.lt.s32.totalorder %s584_s24, %s584_s24 }
  0x30   :  { %p591_p8 = por %p590_p7, %p589_p6 }
  0x32   :  { %p592_p9 = pnand %p591_p8, %p585_p5 }
  0x34   :  { %595 = shalt.err (!%p592_p9)
}
  0x35   :  { %54 = dma.hbm_to_vmem [thread:$0]  %s784_s3, 1024, %s49_s27, [#allocation6], %s625_s20, %s625_s20, %s626_s21  }
  0x36   :  { %s629_s26 = smov [#allocation8]   ;;  %s596_s10 = scalar_lea.hbm %s786_s5, 1024 }
  0x37   :  { %s62_s28 = sshll.u32 %s629_s26, 4  ;;  %p597_p10 = scmp.ne.s32.totalorder %s786_s5, %s596_s10  ;;  %s63_s28 = int_to_ptr.vmem [resolvable:$true] %s62_s28 }
  0x38   :  { %p600_p11 = scmp.lt.u32.totalorder %s596_s10, %s786_s5 }
  0x3a   :  { %p602_p12 = pnand %p600_p11, %p597_p10 }
  0x3c   :  { %605 = shalt.err (!%p602_p12)
}
  0x3d   :  { %s606_s12 = scalar_lea.vmem %s63_s28, 1024  ;;  %p611_p0 = scmp.lt.s32.totalorder %s63_s28, %s63_s28 }
  0x3e   :  { %p607_p13 = scmp.ne.s32.totalorder %s63_s28, %s606_s12  ;;  %p612_p1 = scmp.lt.s32.totalorder %s606_s12, %s606_s12 }
  0x40   :  { %p613_p2 = por %p612_p1, %p611_p0 }
  0x42   :  { %p614_p3 = pnand %p613_p2, %p607_p13 }
  0x44   :  { %617 = shalt.err (!%p614_p3)
}
  0x45   :  { %68 = dma.hbm_to_vmem [thread:$0]  %s786_s5, 1024, %s63_s28, [#allocation9], %s625_s20, %s625_s20, %s626_s21  }
  0x46   :  { %618 = dma.done.wait [#allocation4], 128  }
  0x47   :  { %619 = vsyncadd [#allocation4], 4294967168 }
  0x48   :  { %620 = dma.done.wait [#allocation6], 1280  }
  0x49   :  { %621 = vsyncadd [#allocation6], 4294966016 }
  0x4a   :  { %622 = dma.done.wait [#allocation9], 1024  }
  0x4b   :  { %623 = vsyncadd [#allocation9], 4294966272  ;;  %v630_v1 = vmov 0.0   ;;  %vm631_vm0 = vmmov 0   ;;  %v512_v2 = vld [vmem:[#allocation5] sm:$0xff]   ;;  %v513_v3 = vld [vmem:[#allocation5 + $0x8] sm:$0xff]  }
  0x4c   :  { %456 = vmatprep.subr.bf16.mxu0 %v630_v1  ;;  %460 = vmatprep.mubr.msk.bf16.mxu0 %vm631_vm0, %v630_v1  ;;  %v88_v4 = vld [vmem:[#allocation3] sm:$0xff]  ;;  %v514_v5 = vld [vmem:[#allocation7] sm:$0xff]   ;;  %vm113_vm1 = vcmask 261120   ;;  %v516_v8 = vld [vmem:[#allocation7 + $0x10] sm:$0xff]   ;;  %vm402_vm2 = vcmask 7168  }
  0x4d   :  { %464 = vmatprep.subr.bf16.mxu1 %v630_v1  ;;  %480 = vmatprep.mubr.msk.bf16.mxu1 %vm631_vm0, %v630_v1  ;;  %v89_v6 = vpack.c.bf16 %v88_v4, %v88_v4  ;;  %v515_v7 = vld [vmem:[#allocation7 + $0x8] sm:$0xff]   ;;  %v517_v9 = vld [vmem:[#allocation7 + $0x18] sm:$0xff]   ;;  %v518_v10 = vld [vmem:[#allocation7 + $0x20] sm:$0xff]  }
  0x4e   :  { %457 = vmatpush3.bf16.msra.mxu0 %v512_v2  ;;  %465 = vmatpush3.bf16.msra.mxu1 %v514_v5  ;;  %v519_v11 = vld [vmem:[#allocation7 + $0x28] sm:$0xff]   ;;  %v520_v12 = vld [vmem:[#allocation7 + $0x30] sm:$0xff]   ;;  %v521_v13 = vld [vmem:[#allocation7 + $0x38] sm:$0xff]  }
  0x4f   :  { %458 = vmatprep.subr.bf16.mxu0 %v630_v1  ;;  %466 = vmatprep.subr.bf16.mxu1 %v630_v1  ;;  %v522_v14 = vld [vmem:[#allocation8] sm:$0xff]   ;;  %v523_v15 = vld [vmem:[#allocation8 + $0x8] sm:$0xff]   ;;  %v524_v16 = vld [vmem:[#allocation8 + $0x10] sm:$0xff]  }
  0x50   :  { %v525_v17 = vld [vmem:[#allocation8 + $0x18] sm:$0xff]   ;;  %v526_v18 = vld [vmem:[#allocation8 + $0x20] sm:$0xff]   ;;  %v527_v19 = vld [vmem:[#allocation8 + $0x28] sm:$0xff]  }
  0x51   :  { %v411_v20 = vld [vmem:[%s783_s2] ss:$0 sm:$0xff]  ;;  %v528_v28 = vld [vmem:[#allocation8 + $0x30] sm:$0xff]   ;;  %v529_v29 = vld [vmem:[#allocation8 + $0x38] sm:$0xff]  }
  0x52   :  { %459 = vmatpush3.bf16.msra.mxu0 %v513_v3  ;;  %467 = vmatpush3.bf16.msra.mxu1 %v515_v7  ;;  %v415_v30 = vld [vmem:[%s785_s4] ss:$0 sm:$0xff] }
  0x53   :  { %484 = vmatprep.subr.bf16.mxu0 %v630_v1  ;;  %468 = vmatprep.subr.bf16.mxu1 %v630_v1  ;;  %v424_v38 = vld [vmem:[%s787_s6] ss:$0 sm:$0xff] }
  0x54   :  { %v433_v43 = vld [vmem:[%s788_s7] ss:$0 sm:$0xff] }
  0x55   :  { %461 = vmatmul.mubr.msk.bf16.vlgmr.msra.gmra.mrb[0].mxu0 %vm113_vm1, %v89_v6  ;;  %v434_v47 = vld [vmem:[#allocation2] ss:$0 sm:$0xff] }
  0x56   :  { %500 = vmatprep.mubr.msk.bf16.mxu0 %vm631_vm0, %v630_v1  ;;  %469 = vmatpush3.bf16.msra.mxu1 %v516_v8 }
  0x57   :  { %470 = vmatprep.subr.bf16.mxu1 %v630_v1  ;;  %485 = vmatpush3.bf16.msra.mxu0 %v522_v14 }
  0x58   :  { %486 = vmatprep.subr.bf16.mxu0 %v630_v1 }
  0x5a   :  { %471 = vmatpush3.bf16.msra.mxu1 %v517_v9 }
  0x5b   :  { %472 = vmatprep.subr.bf16.mxu1 %v630_v1  ;;  %487 = vmatpush3.bf16.msra.mxu0 %v523_v15 }
  0x5c   :  { %488 = vmatprep.subr.bf16.mxu0 %v630_v1 }
  0x5e   :  { %473 = vmatpush3.bf16.msra.mxu1 %v518_v10 }
  0x5f   :  { %474 = vmatprep.subr.bf16.mxu1 %v630_v1  ;;  %489 = vmatpush3.bf16.msra.mxu0 %v524_v16 }
  0x60   :  { %490 = vmatprep.subr.bf16.mxu0 %v630_v1 }
  0x62   :  { %475 = vmatpush3.bf16.msra.mxu1 %v519_v11 }
  0x63   :  { %476 = vmatprep.subr.bf16.mxu1 %v630_v1  ;;  %491 = vmatpush3.bf16.msra.mxu0 %v525_v17 }
  0x64   :  { %492 = vmatprep.subr.bf16.mxu0 %v630_v1 }
  0x66   :  { %477 = vmatpush3.bf16.msra.mxu1 %v520_v12 }
  0x67   :  { %478 = vmatprep.subr.bf16.mxu1 %v630_v1  ;;  %493 = vmatpush3.bf16.msra.mxu0 %v526_v18 }
  0x68   :  { %494 = vmatprep.subr.bf16.mxu0 %v630_v1 }
  0x6a   :  { %479 = vmatpush3.bf16.msra.mxu1 %v521_v13 }
  0x6b   :  { %495 = vmatpush3.bf16.msra.mxu0 %v527_v19 }
  0x6c   :  { %496 = vmatprep.subr.bf16.mxu0 %v630_v1 }
  0x6f   :  { %497 = vmatpush3.bf16.msra.mxu0 %v528_v28 }
  0x70   :  { %498 = vmatprep.subr.bf16.mxu0 %v630_v1 }
  0x73   :  { %499 = vmatpush3.bf16.msra.mxu0 %v529_v29 }
 0x128   :  { %v151_v21 = vpop.f32.mrb[0].mxu0 }
 0x129   :  { %v152_v22 = vadd.f32 %v411_v20, %v151_v21  ;;  %v462_v23 = vpop.f32.mrb[1].mxu0 }
 0x12a   :  { %v154_v24 = vpop.f32.mrb[2].mxu0 }
 0x12b   :  { %v157_v25 = vmax.f32 %v152_v22, 0.0  ;;  %v463_v26 = vpop.f32.mrb[3].mxu0 }
 0x12d   :  { %v158_v27 = vpack.c.bf16 %v157_v25, %v157_v25 }
 0x12f   :  { %481 = vmatmul.mubr.bf16.vlgmr.msra.gmra.mrb[0].mxu1 %v158_v27 }
 0x202   :  { %v264_v31 = vpop.f32.mrb[0].mxu1 }
 0x203   :  { %v265_v32 = vadd.f32 %v415_v30, %v264_v31  ;;  %v482_v33 = vpop.f32.mrb[1].mxu1 }
 0x204   :  { %v267_v34 = vpop.f32.mrb[2].mxu1 }
 0x205   :  { %v270_v35 = vmax.f32 %v265_v32, 0.0  ;;  %v483_v36 = vpop.f32.mrb[3].mxu1 }
 0x207   :  { %v271_v37 = vpack.c.bf16 %v270_v35, %v270_v35 }
 0x209   :  { %501 = vmatmul.mubr.bf16.vlgmr.msra.gmra.mrb[4].mxu0 %v271_v37 }
 0x2dc   :  { %v377_v39 = vpop.f32.mrb[4].mxu0 }
 0x2dd   :  { %v378_v40 = vadd.f32 %v424_v38, %v377_v39  ;;  %v502_v41 = vpop.f32.mrb[5].mxu0 }
 0x2de   :  { %v380_v42 = vpop.f32.mrb[6].mxu0 }
 0x2df   :  { %v383_v44 = vmax.f32 %v378_v40, 0.0  ;;  %v503_v45 = vpop.f32.mrb[7].mxu0 }
 0x2e1   :  { %v391_v46 = vmul.f32 %v433_v43, %v383_v44 }
 0x2e3   :  { %392 = vadd.xlane.f32.xlu0 %v391_v46 }
 0x370   :  { %v393_v48 = vpop.xlane.xlu0 %392 }
 0x371   :  { %v401_v49 = vadd.f32 %v434_v47, %v393_v48 }
 0x373   :  { %403 = vst.msk [vmem:[%s790_s9] sm:$0xff] %vm402_vm2, %v401_v49 }
 0x374   :  { %408 = vsyncpa [#allocation4], 1 }
 0x375   :  { %409 = vsyncpa [#allocation6], 1 }
 0x376   :  { %410 = vsyncpa [#allocation9], 1 }

</bundles_post_ra>
